<compile_context>
chip_gen: v7x
topology: tpu7x:2x2x1
jax: 0.10.0
libtpu: 0.0.40
codegen_flags: <defaults>
</compile_context>

<pallas_src>
import jax
import jax.numpy as jnp
from jax.experimental import pallas as pl
from jax.experimental.pallas import tpu as pltpu


def _msg_add_kernel(msg_aux_ref, hidden_ref, out_ref):
    """Steady state: load tile, broadcast-add per-(b, channel) bias, store."""
    # msg_aux block: (block_b, H, 1); hidden/out block: (block_b, H, block_t).
    out_ref[...] = (hidden_ref[...] + msg_aux_ref[...]).astype(out_ref.dtype)


def _vmem_budget_bytes() -> int:
    """Generation-aware VMEM budget (half of physical, capped at 32 MiB)."""
    cap = 64 << 20  # conservative fallback (v7x physical per-TC VMEM)
    try:
        cap = int(pltpu.get_tpu_info().vmem_capacity_bytes)
    except Exception:  # pragma: no cover - query not available everywhere
        pass
    return min(cap // 2, 32 << 20)


def _choose_blocks(B: int, H: int, Tp: int, itemsize: int, tile_budget: int):
    """Pick (block_b, block_t): lane-dense (multiple-of-128) frame tiles of
    roughly `tile_budget` bytes; grow the batch tile when T is short."""
    # Largest multiple of 128 frames that keeps a single-row tile under budget.
    max_bt = max(128, (tile_budget // max(H * itemsize, 1)) // 128 * 128)
    block_t = min(Tp, max_bt)
    # Tp is a multiple of 128, so this terminates at block_t == 128 at worst.
    while Tp % block_t != 0:
        block_t -= 128

    block_b = 1
    if block_t == Tp:
        # Frame axis fully covered by one tile and still small: block batch rows.
        per_row = H * Tp * itemsize
        block_b = max(1, min(B, tile_budget // max(per_row, 1)))
        while B % block_b != 0:
            block_b -= 1
    return block_b, block_t


def msg_processor_forward(hidden: jax.Array, msg: jax.Array, emb: jax.Array) -> jax.Array:
    """hidden: (B, H, T), msg: (B, k) int {0,1}, emb: (2k, H) float32."""
    B, H, T = hidden.shape
    two_k, H2 = emb.shape
    k = msg.shape[-1]
    assert H == H2 and two_k == 2 * k

    # ---- Hoisted (tiny) message embedding: indices = 2*i + msg; gather & sum.
    indices = 2 * jnp.arange(k, dtype=jnp.int32)[None, :] + msg.astype(jnp.int32)
    msg_aux = jnp.take(emb.astype(jnp.float32), indices, axis=0).sum(axis=-2)  # (B, H)
    msg_aux3 = msg_aux.astype(hidden.dtype)[:, :, None]                        # (B, H, 1)

    # ---- Pad frames up to a multiple of 128 so stores stay lane-dense.
    Tp = max(128, pl.cdiv(T, 128) * 128)
    hidden_p = hidden if Tp == T else jnp.pad(hidden, ((0, 0), (0, 0), (0, Tp - T)))

    itemsize = jnp.dtype(hidden.dtype).itemsize
    budget = _vmem_budget_bytes()
    tile_budget = budget // 8  # 2 streams x 2 buffers, with ~2x headroom
    block_b, block_t = _choose_blocks(B, H, Tp, itemsize, tile_budget)
    grid = (B // block_b, Tp // block_t)

    out_p = pl.pallas_call(
        _msg_add_kernel,
        out_shape=jax.ShapeDtypeStruct((B, H, Tp), hidden.dtype),
        grid=grid,
        in_specs=[
            pl.BlockSpec((block_b, H, 1), lambda b, t: (b, 0, 0)),        # msg_aux
            pl.BlockSpec((block_b, H, block_t), lambda b, t: (b, 0, t)),  # hidden tile
        ],
        out_specs=pl.BlockSpec((block_b, H, block_t), lambda b, t: (b, 0, t)),
        input_output_aliases={1: 0},  # hidden -> out (same shape/dtype)
        compiler_params=pltpu.CompilerParams(
            dimension_semantics=("parallel", "parallel"),
            vmem_limit_bytes=int(budget),
        ),
    )(msg_aux3, hidden_p)

    return out_p if Tp == T else out_p[:, :, :T]


def msg_processor_reference(hidden, msg, emb):
    """Pure-JAX reference mirroring the PyTorch forward."""
    _, k = msg.shape
    indices = 2 * jnp.arange(k, dtype=jnp.int32)[None, :] + msg.astype(jnp.int32)
    msg_aux = jnp.take(emb, indices, axis=0).sum(axis=-2)  # (B, H)
    return hidden + msg_aux[:, :, None]


if __name__ == "__main__":
    # Small shapes consistent with the module: batch=2, nbits=8, hidden=32,
    # frames=1024 (multiple of 128 -> no padding; tiles are lane-dense).
    B, nbits, H, T = 2, 8, 32, 1024

    key = jax.random.PRNGKey(0)
    k_emb, k_hidden, k_msg = jax.random.split(key, 3)

    emb = jax.random.normal(k_emb, (2 * nbits, H), dtype=jnp.float32)
    hidden = jax.random.normal(k_hidden, (B, H, T), dtype=jnp.float32)
    msg = jax.random.bernoulli(k_msg, 0.5, (B, nbits)).astype(jnp.int32)

    out = jax.jit(msg_processor_forward)(hidden, msg, emb)
    out = jax.block_until_ready(out)

    ref = msg_processor_reference(hidden, msg, emb)
    assert out.shape == (B, H, T)
    assert jnp.allclose(out, ref, atol=1e-5, rtol=1e-5), "mismatch vs reference"

    print("KERNEL_OK")
</pallas_src>

<mosaic_0001>
module attributes {stable_mosaic.version = 11 : i64} {
  func.func @_msg_add_kernel(%arg0: i32, %arg1: i32, %arg2: memref<2x32x1xf32, #tpu.memory_space<vmem>>, %arg3: memref<2x32x1024xf32, #tpu.memory_space<vmem>>, %arg4: memref<2x32x1024xf32, #tpu.memory_space<vmem>>) attributes {dimension_semantics = [#tpu.dimension_semantics<parallel>, #tpu.dimension_semantics<parallel>], iteration_bounds = array<i64: 1, 1>, scalar_prefetch = 0 : i64, scratch_operands = 0 : i64, tpu.core_type = #tpu.core_type<tc>, window_params = [{transform_indices = @transform_0, window_bounds = array<i64: 2, 32, 1>}, {transform_indices = @transform_1, window_bounds = array<i64: 2, 32, 1024>}, {transform_indices = @transform_2, window_bounds = array<i64: 2, 32, 1024>}]} {
    %c0 = arith.constant 0 : index
    %c0_0 = arith.constant 0 : index
    %c0_1 = arith.constant 0 : index
    %0 = vector.load %arg3[%c0, %c0_0, %c0_1] : memref<2x32x1024xf32, #tpu.memory_space<vmem>>, vector<2x32x1024xf32>
    %c0_2 = arith.constant 0 : index
    %c0_3 = arith.constant 0 : index
    %c0_4 = arith.constant 0 : index
    %1 = vector.load %arg2[%c0_2, %c0_3, %c0_4] : memref<2x32x1xf32, #tpu.memory_space<vmem>>, vector<2x32x1xf32>
    %2 = vector.broadcast %1 : vector<2x32x1xf32> to vector<2x32x1024xf32>
    %3 = arith.addf %0, %2 : vector<2x32x1024xf32>
    %c0_5 = arith.constant 0 : index
    %c0_6 = arith.constant 0 : index
    %c0_7 = arith.constant 0 : index
    %4 = vector.load %arg4[%c0_5, %c0_6, %c0_7] : memref<2x32x1024xf32, #tpu.memory_space<vmem>>, vector<2x32x1024xf32>
    tpu.vector_store %arg4[%c0_5, %c0_6, %c0_7], %3 {strides = array<i32>} : memref<2x32x1024xf32, #tpu.memory_space<vmem>>, vector<2x32x1024xf32>,
    return
  }
  func.func @transform_0(%arg0: i32, %arg1: i32) -> (i32, i32, i32) {
    %c0_i32 = arith.constant 0 : i32
    %c0_i32_0 = arith.constant 0 : i32
    %c0_i32_1 = arith.constant 0 : i32
    return %arg0, %c0_i32, %c0_i32_0 : i32, i32, i32
  }
  func.func @transform_1(%arg0: i32, %arg1: i32) -> (i32, i32, i32) {
    %c0_i32 = arith.constant 0 : i32
    %c0_i32_0 = arith.constant 0 : i32
    return %arg0, %c0_i32, %arg1 : i32, i32, i32
  }
  func.func @transform_2(%arg0: i32, %arg1: i32) -> (i32, i32, i32) {
    %c0_i32 = arith.constant 0 : i32
    %c0_i32_0 = arith.constant 0 : i32
    return %arg0, %c0_i32, %arg1 : i32, i32, i32
  }
}

</mosaic_0001>

<bundles_post_ra>
// kernel: msg_processor_forward.1
= control target key start
LH: loop header
LB: loop body
LE: loop exit
PB: predicated region body
PF: predicated region fallthrough
CT: control target
= control target key end

     0   :  { %7 = vsyncpa [#allocation3], 0  ;;  %s412_s0 = inlined_call_operand.vmem [shape: f32[2,32,1], index: 0, kind: input, shape index: {}]   ;;  %s413_s1 = inlined_call_operand.hbm [shape: f32[2,32,1024], index: 1, kind: input, shape index: {}, may-alias: {1,2}]   ;;  %s414_s2 = inlined_call_operand.hbm [shape: f32[2,32,1024], index: 2, kind: output, shape index: {}, may-alias: {1,2}]  }
   0x1   :  { %8 = vsyncpa [#allocation4], 0  ;;  %s338_s9 = smov [#allocation2]   ;;  %s290_s13 = scalar_lea.hbm %s413_s1, 8192 }
   0x2   :  { %s16_s10 = sshll.u32 %s338_s9, 4  ;;  %p291_p0 = scmp.ne.s32.totalorder %s413_s1, %s290_s13  ;;  %s17_s10 = int_to_ptr.vmem [resolvable:$true] %s16_s10 }
   0x3   :  { %p294_p1 = scmp.lt.u32.totalorder %s290_s13, %s413_s1 }
   0x5   :  { %p296_p2 = pnand %p294_p1, %p291_p0 }
   0x7   :  { %299 = shalt.err (!%p296_p2)
}
   0x8   :  { %s300_s18 = scalar_lea.vmem %s17_s10, 8192  ;;  %p305_p4 = scmp.lt.s32.totalorder %s17_s10, %s17_s10 }
   0x9   :  { %p301_p3 = scmp.ne.s32.totalorder %s17_s10, %s300_s18  ;;  %p306_p5 = scmp.lt.s32.totalorder %s300_s18, %s300_s18 }
   0xb   :  { %p307_p6 = por %p306_p5, %p305_p4 }
   0xd   :  { %p308_p7 = pnand %p307_p6, %p301_p3 }
   0xf   :  { %311 = shalt.err (!%p308_p7)
}
  0x10   :  { %s339_s19 = smov 1024   ;;  %s340_s20 = smov 64  }
  0x11   :  { %22 = dma.hbm_to_vmem [thread:$0]  %s413_s1, 8192, %s17_s10, [#allocation3], %s339_s19, %s339_s19, %s340_s20  }
  0x12   :  { %334 = dma.done.wait [#allocation3], 8192  }
  0x13   :  { %335 = vsyncadd [#allocation3], 4294959104  ;;  %v341_v0 = vmov 0   ;;  %v92_v1 = vld [vmem:[%s412_s0 + $0x10] sm:$0xff]  ;;  %v90_v2 = vld [vmem:[%s412_s0] sm:$0xff] }
  0x14   :  { %289 = vset.pattern.permute.xlu1 %v341_v0  ;;  %288 = vset.pattern.permute.xlu0 %v341_v0  ;;  %v93_v3 = vld [vmem:[%s412_s0 + $0x18] sm:$0xff]  ;;  %v91_v4 = vld [vmem:[%s412_s0 + $0x8] sm:$0xff]  ;;  %v94_v6 = vld [vmem:[%s412_s0 + $0x20] sm:$0xff] }
  0x15   :  { %110 = vperm.xlu1 %289, %v92_v1   ;;  %100 = vperm.xlu0 %288, %v90_v2   ;;  %v95_v5 = vld [vmem:[%s412_s0 + $0x28] sm:$0xff]  ;;  %v97_v7 = vld [vmem:[%s412_s0 + $0x38] sm:$0xff]  ;;  %v96_v8 = vld [vmem:[%s412_s0 + $0x30] sm:$0xff]  ;;  %s342_s0 = smov [#allocation5]  }
  0x16   :  { %v42_v9 = vld [vmem:[#allocation2 + $0x80] sm:$0xff]  ;;  %v43_v10 = vld [vmem:[#allocation2 + $0x88] sm:$0xff]  ;;  %v44_v11 = vld [vmem:[#allocation2 + $0x90] sm:$0xff]  ;;  %s271_s10 = sshll.u32 %s342_s0, 4  ;;  %s272_s10 = int_to_ptr.vmem [resolvable:$true] %s271_s10 }
  0x17   :  { %v45_v12 = vld [vmem:[#allocation2 + $0x98] sm:$0xff]  ;;  %v46_v13 = vld [vmem:[#allocation2 + $0xa0] sm:$0xff]  ;;  %v47_v14 = vld [vmem:[#allocation2 + $0xa8] sm:$0xff]  ;;  %s312_s11 = scalar_lea.vmem %s272_s10, 8192  ;;  %p317_p9 = scmp.lt.s32.totalorder %s272_s10, %s272_s10 }
  0x18   :  { %v48_v15 = vld [vmem:[#allocation2 + $0xb0] sm:$0xff]  ;;  %v49_v16 = vld [vmem:[#allocation2 + $0xb8] sm:$0xff]  ;;  %v26_v17 = vld [vmem:[#allocation2] sm:$0xff]  ;;  %p313_p8 = scmp.ne.s32.totalorder %s272_s10, %s312_s11  ;;  %p318_p10 = scmp.lt.s32.totalorder %s312_s11, %s312_s11 }
  0x19   :  { %115 = vperm.xlu1 %289, %v93_v3   ;;  %105 = vperm.xlu0 %288, %v91_v4   ;;  %v27_v18 = vld [vmem:[#allocation2 + $0x8] sm:$0xff]  ;;  %v28_v19 = vld [vmem:[#allocation2 + $0x10] sm:$0xff]  ;;  %v29_v20 = vld [vmem:[#allocation2 + $0x18] sm:$0xff] }
  0x1a   :  { %v30_v21 = vld [vmem:[#allocation2 + $0x20] sm:$0xff]  ;;  %v31_v22 = vld [vmem:[#allocation2 + $0x28] sm:$0xff]  ;;  %v32_v23 = vld [vmem:[#allocation2 + $0x30] sm:$0xff]  ;;  %p319_p11 = por %p318_p10, %p317_p9 }
  0x1b   :  { %v33_v24 = vld [vmem:[#allocation2 + $0x38] sm:$0xff]  ;;  %v50_v27 = vld [vmem:[#allocation2 + $0xc0] sm:$0xff]  ;;  %v51_v28 = vld [vmem:[#allocation2 + $0xc8] sm:$0xff] }
  0x1c   :  { %v52_v29 = vld [vmem:[#allocation2 + $0xd0] sm:$0xff]  ;;  %v53_v30 = vld [vmem:[#allocation2 + $0xd8] sm:$0xff]  ;;  %v54_v35 = vld [vmem:[#allocation2 + $0xe0] sm:$0xff]  ;;  %p320_p12 = pnand %p319_p11, %p313_p8 }
  0x1d   :  { %125 = vperm.xlu1 %289, %v95_v5   ;;  %120 = vperm.xlu0 %288, %v94_v6   ;;  %v55_v36 = vld [vmem:[#allocation2 + $0xe8] sm:$0xff]  ;;  %v56_v37 = vld [vmem:[#allocation2 + $0xf0] sm:$0xff]  ;;  %v57_v38 = vld [vmem:[#allocation2 + $0xf8] sm:$0xff] }
  0x1e   :  { %v34_v43 = vld [vmem:[#allocation2 + $0x40] sm:$0xff]  ;;  %v35_v44 = vld [vmem:[#allocation2 + $0x48] sm:$0xff]  ;;  %v36_v45 = vld [vmem:[#allocation2 + $0x50] sm:$0xff] }
  0x1f   :  { %v37_v46 = vld [vmem:[#allocation2 + $0x58] sm:$0xff]  ;;  %v38_v51 = vld [vmem:[#allocation2 + $0x60] sm:$0xff]  ;;  %v39_v52 = vld [vmem:[#allocation2 + $0x68] sm:$0xff] }
  0x20   :  { %v40_v53 = vld [vmem:[#allocation2 + $0x70] sm:$0xff]  ;;  %v41_v54 = vld [vmem:[#allocation2 + $0x78] sm:$0xff]  ;;  %v66_v61 = vld [vmem:[#allocation2 + $0x140] sm:$0xff] }
  0x21   :  { %135 = vperm.xlu1 %289, %v97_v7   ;;  %130 = vperm.xlu0 %288, %v96_v8   ;;  %v67_v62 = vld [vmem:[#allocation2 + $0x148] sm:$0xff]  ;;  %v68_v63 = vld [vmem:[#allocation2 + $0x150] sm:$0xff]  ;;  %v69_v0 = vld [vmem:[#allocation2 + $0x158] sm:$0xff] }
  0x22   :  { %v70_v5 = vld [vmem:[#allocation2 + $0x160] sm:$0xff]  ;;  %v71_v6 = vld [vmem:[#allocation2 + $0x168] sm:$0xff]  ;;  %v72_v7 = vld [vmem:[#allocation2 + $0x170] sm:$0xff] }
  0x23   :  { %v73_v8 = vld [vmem:[#allocation2 + $0x178] sm:$0xff] }
  0x94   :  { %v111_v25 = vpop.permute.xlu1 %110  ;;  %v101_v26 = vpop.permute.xlu0 %100 }
  0x95   :  { %v154_v31 = vadd.f32 %v111_v25, %v42_v9  ;;  %v155_v32 = vadd.f32 %v111_v25, %v43_v10  ;;  %v156_v33 = vadd.f32 %v111_v25, %v44_v11  ;;  %v157_v34 = vadd.f32 %v111_v25, %v45_v12 }
  0x96   :  { %v158_v39 = vadd.f32 %v111_v25, %v46_v13  ;;  %v159_v40 = vadd.f32 %v111_v25, %v47_v14  ;;  %v160_v41 = vadd.f32 %v111_v25, %v48_v15  ;;  %v161_v42 = vadd.f32 %v111_v25, %v49_v16  ;;  %v58_v13 = vld [vmem:[#allocation2 + $0x100] sm:$0xff]  ;;  %v59_v14 = vld [vmem:[#allocation2 + $0x108] sm:$0xff]  ;;  %v60_v15 = vld [vmem:[#allocation2 + $0x110] sm:$0xff] }
  0x97   :  { %218 = vst [vmem:[#allocation5 + $0x80] sm:$0xff] %v154_v31  ;;  %219 = vst [vmem:[#allocation5 + $0x88] sm:$0xff] %v155_v32  ;;  %v138_v47 = vadd.f32 %v101_v26, %v26_v17  ;;  %v139_v48 = vadd.f32 %v101_v26, %v27_v18  ;;  %v140_v49 = vadd.f32 %v101_v26, %v28_v19  ;;  %v82_v31 = vld [vmem:[#allocation2 + $0x1c0] sm:$0xff] }
  0x98   :  { %220 = vst [vmem:[#allocation5 + $0x90] sm:$0xff] %v156_v33  ;;  %221 = vst [vmem:[#allocation5 + $0x98] sm:$0xff] %v157_v34  ;;  %v141_v50 = vadd.f32 %v101_v26, %v29_v20  ;;  %v142_v55 = vadd.f32 %v101_v26, %v30_v21  ;;  %v143_v56 = vadd.f32 %v101_v26, %v31_v22  ;;  %v116_v59 = vpop.permute.xlu1 %115  ;;  %v106_v60 = vpop.permute.xlu0 %105  ;;  %v61_v20 = vld [vmem:[#allocation2 + $0x118] sm:$0xff]  ;;  %v62_v21 = vld [vmem:[#allocation2 + $0x120] sm:$0xff] }
  0x99   :  { %222 = vst [vmem:[#allocation5 + $0xa0] sm:$0xff] %v158_v39  ;;  %223 = vst [vmem:[#allocation5 + $0xa8] sm:$0xff] %v159_v40  ;;  %v144_v57 = vadd.f32 %v101_v26, %v32_v23  ;;  %v145_v58 = vadd.f32 %v101_v26, %v33_v24  ;;  %v162_v1 = vadd.f32 %v116_v59, %v50_v27  ;;  %v63_v22 = vld [vmem:[#allocation2 + $0x128] sm:$0xff] }
  0x9a   :  { %224 = vst [vmem:[#allocation5 + $0xb0] sm:$0xff] %v160_v41  ;;  %225 = vst [vmem:[#allocation5 + $0xb8] sm:$0xff] %v161_v42  ;;  %v163_v2 = vadd.f32 %v116_v59, %v51_v28  ;;  %v164_v3 = vadd.f32 %v116_v59, %v52_v29  ;;  %v165_v4 = vadd.f32 %v116_v59, %v53_v30  ;;  %v64_v29 = vld [vmem:[#allocation2 + $0x130] sm:$0xff]  ;;  %v65_v30 = vld [vmem:[#allocation2 + $0x138] sm:$0xff] }
  0x9b   :  { %202 = vst [vmem:[#allocation5] sm:$0xff] %v138_v47  ;;  %203 = vst [vmem:[#allocation5 + $0x8] sm:$0xff] %v139_v48  ;;  %v166_v9 = vadd.f32 %v116_v59, %v54_v35  ;;  %v167_v10 = vadd.f32 %v116_v59, %v55_v36  ;;  %v168_v11 = vadd.f32 %v116_v59, %v56_v37  ;;  %v83_v36 = vld [vmem:[#allocation2 + $0x1c8] sm:$0xff]  ;;  %v84_v37 = vld [vmem:[#allocation2 + $0x1d0] sm:$0xff] }
  0x9c   :  { %204 = vst [vmem:[#allocation5 + $0x10] sm:$0xff] %v140_v49  ;;  %205 = vst [vmem:[#allocation5 + $0x18] sm:$0xff] %v141_v50  ;;  %v169_v12 = vadd.f32 %v116_v59, %v57_v38  ;;  %v146_v16 = vadd.f32 %v106_v60, %v34_v43  ;;  %v147_v17 = vadd.f32 %v106_v60, %v35_v44  ;;  %v126_v27 = vpop.permute.xlu1 %125  ;;  %v121_v28 = vpop.permute.xlu0 %120  ;;  %v85_v38 = vld [vmem:[#allocation2 + $0x1d8] sm:$0xff]  ;;  %v86_v43 = vld [vmem:[#allocation2 + $0x1e0] sm:$0xff] }
  0x9d   :  { %206 = vst [vmem:[#allocation5 + $0x20] sm:$0xff] %v142_v55  ;;  %207 = vst [vmem:[#allocation5 + $0x28] sm:$0xff] %v143_v56  ;;  %v148_v18 = vadd.f32 %v106_v60, %v36_v45  ;;  %v149_v19 = vadd.f32 %v106_v60, %v37_v46  ;;  %v150_v23 = vadd.f32 %v106_v60, %v38_v51  ;;  %v87_v44 = vld [vmem:[#allocation2 + $0x1e8] sm:$0xff]  ;;  %v88_v45 = vld [vmem:[#allocation2 + $0x1f0] sm:$0xff] }
  0x9e   :  { %208 = vst [vmem:[#allocation5 + $0x30] sm:$0xff] %v144_v57  ;;  %209 = vst [vmem:[#allocation5 + $0x38] sm:$0xff] %v145_v58  ;;  %v151_v24 = vadd.f32 %v106_v60, %v39_v52  ;;  %v152_v25 = vadd.f32 %v106_v60, %v40_v53  ;;  %v153_v26 = vadd.f32 %v106_v60, %v41_v54  ;;  %v89_v50 = vld [vmem:[#allocation2 + $0x1f8] sm:$0xff]  ;;  %v74_v51 = vld [vmem:[#allocation2 + $0x180] sm:$0xff] }
  0x9f   :  { %226 = vst [vmem:[#allocation5 + $0xc0] sm:$0xff] %v162_v1  ;;  %227 = vst [vmem:[#allocation5 + $0xc8] sm:$0xff] %v163_v2  ;;  %v178_v32 = vadd.f32 %v126_v27, %v66_v61  ;;  %v179_v33 = vadd.f32 %v126_v27, %v67_v62  ;;  %v180_v34 = vadd.f32 %v126_v27, %v68_v63  ;;  %v75_v52 = vld [vmem:[#allocation2 + $0x188] sm:$0xff]  ;;  %v76_v59 = vld [vmem:[#allocation2 + $0x190] sm:$0xff] }
  0xa0   :  { %228 = vst [vmem:[#allocation5 + $0xd0] sm:$0xff] %v164_v3  ;;  %229 = vst [vmem:[#allocation5 + $0xd8] sm:$0xff] %v165_v4  ;;  %v181_v35 = vadd.f32 %v126_v27, %v69_v0  ;;  %v182_v39 = vadd.f32 %v126_v27, %v70_v5  ;;  %v183_v40 = vadd.f32 %v126_v27, %v71_v6  ;;  %v136_v57 = vpop.permute.xlu1 %135  ;;  %v131_v58 = vpop.permute.xlu0 %130  ;;  %v77_v60 = vld [vmem:[#allocation2 + $0x198] sm:$0xff]  ;;  %v78_v61 = vld [vmem:[#allocation2 + $0x1a0] sm:$0xff] }
  0xa1   :  { %230 = vst [vmem:[#allocation5 + $0xe0] sm:$0xff] %v166_v9  ;;  %231 = vst [vmem:[#allocation5 + $0xe8] sm:$0xff] %v167_v10  ;;  %v184_v41 = vadd.f32 %v126_v27, %v72_v7  ;;  %v185_v42 = vadd.f32 %v126_v27, %v73_v8  ;;  %v170_v46 = vadd.f32 %v121_v28, %v58_v13  ;;  %v79_v2 = vld [vmem:[#allocation2 + $0x1a8] sm:$0xff]  ;;  %v80_v3 = vld [vmem:[#allocation2 + $0x1b0] sm:$0xff] }
  0xa2   :  { %232 = vst [vmem:[#allocation5 + $0xf0] sm:$0xff] %v168_v11  ;;  %233 = vst [vmem:[#allocation5 + $0xf8] sm:$0xff] %v169_v12  ;;  %v171_v47 = vadd.f32 %v121_v28, %v59_v14  ;;  %v172_v48 = vadd.f32 %v121_v28, %v60_v15  ;;  %v173_v49 = vadd.f32 %v121_v28, %v61_v20  ;;  %v81_v4 = vld [vmem:[#allocation2 + $0x1b8] sm:$0xff] }
  0xa3   :  { %210 = vst [vmem:[#allocation5 + $0x40] sm:$0xff] %v146_v16  ;;  %211 = vst [vmem:[#allocation5 + $0x48] sm:$0xff] %v147_v17  ;;  %v174_v53 = vadd.f32 %v121_v28, %v62_v21  ;;  %v175_v54 = vadd.f32 %v121_v28, %v63_v22  ;;  %v176_v55 = vadd.f32 %v121_v28, %v64_v29 }
  0xa4   :  { %212 = vst [vmem:[#allocation5 + $0x50] sm:$0xff] %v148_v18  ;;  %213 = vst [vmem:[#allocation5 + $0x58] sm:$0xff] %v149_v19  ;;  %v177_v56 = vadd.f32 %v121_v28, %v65_v30  ;;  %v194_v62 = vadd.f32 %v136_v57, %v82_v31  ;;  %v195_v63 = vadd.f32 %v136_v57, %v83_v36 }
  0xa5   :  { %214 = vst [vmem:[#allocation5 + $0x60] sm:$0xff] %v150_v23  ;;  %215 = vst [vmem:[#allocation5 + $0x68] sm:$0xff] %v151_v24  ;;  %v196_v0 = vadd.f32 %v136_v57, %v84_v37  ;;  %v197_v1 = vadd.f32 %v136_v57, %v85_v38  ;;  %v198_v5 = vadd.f32 %v136_v57, %v86_v43 }
  0xa6   :  { %216 = vst [vmem:[#allocation5 + $0x70] sm:$0xff] %v152_v25  ;;  %217 = vst [vmem:[#allocation5 + $0x78] sm:$0xff] %v153_v26  ;;  %v199_v6 = vadd.f32 %v136_v57, %v87_v44  ;;  %v200_v7 = vadd.f32 %v136_v57, %v88_v45  ;;  %v201_v8 = vadd.f32 %v136_v57, %v89_v50 }
  0xa7   :  { %242 = vst [vmem:[#allocation5 + $0x140] sm:$0xff] %v178_v32  ;;  %243 = vst [vmem:[#allocation5 + $0x148] sm:$0xff] %v179_v33  ;;  %v186_v9 = vadd.f32 %v131_v58, %v74_v51  ;;  %v187_v10 = vadd.f32 %v131_v58, %v75_v52  ;;  %v188_v11 = vadd.f32 %v131_v58, %v76_v59 }
  0xa8   :  { %244 = vst [vmem:[#allocation5 + $0x150] sm:$0xff] %v180_v34  ;;  %245 = vst [vmem:[#allocation5 + $0x158] sm:$0xff] %v181_v35  ;;  %v189_v12 = vadd.f32 %v131_v58, %v77_v60  ;;  %v190_v13 = vadd.f32 %v131_v58, %v78_v61  ;;  %v191_v14 = vadd.f32 %v131_v58, %v79_v2 }
  0xa9   :  { %246 = vst [vmem:[#allocation5 + $0x160] sm:$0xff] %v182_v39  ;;  %247 = vst [vmem:[#allocation5 + $0x168] sm:$0xff] %v183_v40  ;;  %v192_v15 = vadd.f32 %v131_v58, %v80_v3  ;;  %v193_v16 = vadd.f32 %v131_v58, %v81_v4 }
  0xaa   :  { %248 = vst [vmem:[#allocation5 + $0x170] sm:$0xff] %v184_v41  ;;  %249 = vst [vmem:[#allocation5 + $0x178] sm:$0xff] %v185_v42 }
  0xab   :  { %234 = vst [vmem:[#allocation5 + $0x100] sm:$0xff] %v170_v46  ;;  %235 = vst [vmem:[#allocation5 + $0x108] sm:$0xff] %v171_v47 }
  0xac   :  { %236 = vst [vmem:[#allocation5 + $0x110] sm:$0xff] %v172_v48  ;;  %237 = vst [vmem:[#allocation5 + $0x118] sm:$0xff] %v173_v49 }
  0xad   :  { %238 = vst [vmem:[#allocation5 + $0x120] sm:$0xff] %v174_v53  ;;  %239 = vst [vmem:[#allocation5 + $0x128] sm:$0xff] %v175_v54 }
  0xae   :  { %240 = vst [vmem:[#allocation5 + $0x130] sm:$0xff] %v176_v55  ;;  %241 = vst [vmem:[#allocation5 + $0x138] sm:$0xff] %v177_v56 }
  0xaf   :  { %258 = vst [vmem:[#allocation5 + $0x1c0] sm:$0xff] %v194_v62  ;;  %259 = vst [vmem:[#allocation5 + $0x1c8] sm:$0xff] %v195_v63 }
  0xb0   :  { %260 = vst [vmem:[#allocation5 + $0x1d0] sm:$0xff] %v196_v0  ;;  %261 = vst [vmem:[#allocation5 + $0x1d8] sm:$0xff] %v197_v1 }
  0xb1   :  { %262 = vst [vmem:[#allocation5 + $0x1e0] sm:$0xff] %v198_v5  ;;  %263 = vst [vmem:[#allocation5 + $0x1e8] sm:$0xff] %v199_v6 }
  0xb2   :  { %264 = vst [vmem:[#allocation5 + $0x1f0] sm:$0xff] %v200_v7  ;;  %265 = vst [vmem:[#allocation5 + $0x1f8] sm:$0xff] %v201_v8 }
  0xb3   :  { %250 = vst [vmem:[#allocation5 + $0x180] sm:$0xff] %v186_v9  ;;  %251 = vst [vmem:[#allocation5 + $0x188] sm:$0xff] %v187_v10 }
  0xb4   :  { %252 = vst [vmem:[#allocation5 + $0x190] sm:$0xff] %v188_v11  ;;  %253 = vst [vmem:[#allocation5 + $0x198] sm:$0xff] %v189_v12 }
  0xb5   :  { %254 = vst [vmem:[#allocation5 + $0x1a0] sm:$0xff] %v190_v13  ;;  %255 = vst [vmem:[#allocation5 + $0x1a8] sm:$0xff] %v191_v14 }
  0xb6   :  { %256 = vst [vmem:[#allocation5 + $0x1b0] sm:$0xff] %v192_v15  ;;  %257 = vst [vmem:[#allocation5 + $0x1b8] sm:$0xff] %v193_v16 }
  0xb7   :  { %323 = shalt.err (!%p320_p12)
}
  0xb8   :  { %s324_s14 = scalar_lea.hbm %s414_s2, 8192 }
  0xb9   :  { %p325_p13 = scmp.ne.s32.totalorder %s414_s2, %s324_s14  ;;  %p328_p0 = scmp.lt.u32.totalorder %s324_s14, %s414_s2 }
  0xbb   :  { %p330_p1 = pnand %p328_p0, %p325_p13 }
  0xbd   :  { %333 = shalt.err (!%p330_p1)
}
  0xbe   :  { %277 = dma.vmem_to_hbm [thread:$0]  %s272_s10, 8192, %s414_s2, [#allocation4], %s339_s19, %s339_s19, %s340_s20  }
  0xbf   :  { %336 = dma.done.wait [#allocation4], 8192  }
  0xc0   :  { %337 = vsyncadd [#allocation4], 4294959104 }
  0xc1   :  { %281 = vsyncpa [#allocation3], 1 }
  0xc2   :  { %282 = vsyncpa [#allocation4], 1 }

</bundles_post_ra>
